<compile_context>
chip_gen: v7x
topology: tpu7x:2x2x1
jax: 0.10.0
libtpu: 0.0.40
codegen_flags: <defaults>
</compile_context>

<pallas_src>
import numpy as np
import jax
import jax.numpy as jnp
from jax.experimental import pallas as pl
from jax.experimental.pallas import tpu as pltpu

HIGH = jax.lax.Precision.HIGHEST


def _round_up(x, m):
    return ((x + m - 1) // m) * m


# ----------------------------------------------------------------------------
# Kernel 1: framed signal -> magnitude spectrogram
#   frames_ref : (RB, W)      bf16 rows of (already framed) audio, time-major
#   trig_ref   : (W, 2*FP)    bf16 [window*cos | window*sin], zero-padded lanes
#   mag_ref    : (RB, FP)     bf16 |STFT| (valid columns: first F)
# ----------------------------------------------------------------------------
def stft_mag_kernel(frames_ref, trig_ref, mag_ref):
    fp = trig_ref.shape[1] // 2
    reim = jnp.dot(frames_ref[...], trig_ref[...],
                   preferred_element_type=jnp.float32)        # (RB, 2*FP) f32
    re = reim[:, :fp]
    im = reim[:, fp:]
    mag_ref[...] = jnp.sqrt(re * re + im * im + 1e-9).astype(mag_ref.dtype)


# ----------------------------------------------------------------------------
# Kernel 2: GRU (batch_first, 1 layer) + Linear(H, 2) + Softmax
#   grid = (B_pad//Bb, T_pad//TC); time axis sequential ("arbitrary"),
#   hidden state carried across time blocks in hcar_ref.
#   Each gate occupies its own 128-aligned lane band of width Hp (>= H).
# ----------------------------------------------------------------------------
def gru_head_kernel(spec_ref,                 # (TC, Bb, FP) bf16
                    w_in3_ref, b_in3_ref,     # (FP, 3Hp), (1, 3Hp)  f32
                    w_hh3_ref, b_hh3_ref,     # (Hp, 3Hp), (1, 3Hp)  f32
                    w_lin_ref, b_lin_ref,     # (Hp, 2),   (1, 2)    f32
                    out_ref,                  # (TC, Bb, 2) f32
                    x3_ref,                   # scratch (TC, Bb, 3Hp)
                    hs_ref,                   # scratch (TC, Bb, Hp)
                    hcar_ref):                # scratch (Bb, Hp), persists over T
    TC, Bb, FP = spec_ref.shape
    Hp = w_hh3_ref.shape[0]

    # reset the hidden-state carry at the first time block of each batch block
    @pl.when(pl.program_id(1) == 0)
    def _():
        hcar_ref[...] = jnp.zeros_like(hcar_ref)

    # hoisted input projection for the whole time block: (TC*Bb, FP) @ (FP, 3Hp)
    x = spec_ref[...].astype(jnp.float32).reshape(TC * Bb, FP)
    x3 = jnp.dot(x, w_in3_ref[...],
                 preferred_element_type=jnp.float32) + b_in3_ref[...]
    x3_ref[...] = x3.reshape(TC, Bb, 3 * Hp)

    # recurrence: one packed (Bb, Hp) x (Hp, 3Hp) matmul per timestep,
    # gate slices are 128-lane aligned; loop manually unrolled 2x.
    def one_step(t, h):
        x3_t = x3_ref[t]                                      # (Bb, 3Hp)
        hh = jnp.dot(h, w_hh3_ref[...],
                     preferred_element_type=jnp.float32) + b_hh3_ref[...]
        r = jax.nn.sigmoid(x3_t[:, 0 * Hp:1 * Hp] + hh[:, 0 * Hp:1 * Hp])
        z = jax.nn.sigmoid(x3_t[:, 1 * Hp:2 * Hp] + hh[:, 1 * Hp:2 * Hp])
        n = jnp.tanh(x3_t[:, 2 * Hp:3 * Hp] + r * hh[:, 2 * Hp:3 * Hp])
        h_new = (1.0 - z) * n + z * h                         # (Bb, Hp)
        hs_ref[t] = h_new
        return h_new

    def two_steps(i, h):                                      # TC is always even
        h = one_step(2 * i, h)
        h = one_step(2 * i + 1, h)
        return h

    h_final = jax.lax.fori_loop(0, TC // 2, two_steps, hcar_ref[...])
    hcar_ref[...] = h_final

    # head: one (TC*Bb, Hp) @ (Hp, 2) matmul; 2-class softmax == sigmoid
    hs = hs_ref[...].reshape(TC * Bb, Hp)
    logits = jnp.dot(hs, w_lin_ref[...],
                     preferred_element_type=jnp.float32) + b_lin_ref[...]
    probs = jax.nn.sigmoid(2.0 * logits
                           - jnp.sum(logits, axis=-1, keepdims=True))
    out_ref[...] = probs.reshape(TC, Bb, 2)


# ----------------------------------------------------------------------------
# Wrapper: full VAD forward
# ----------------------------------------------------------------------------
def vad_forward(x, params, *, n_fft, win_len, hop_len):
    B, L = x.shape
    W = win_len
    F = n_fft // 2 + 1
    FP = _round_up(F, 128)
    H = F // 2                      # torch module: GRU hidden = input_size // 2
    Hp = _round_up(H, 128)
    T = (L - W) // hop_len + 1

    # ---- block sizes --------------------------------------------------------
    if T <= 128:
        TC = _round_up(T, 8)        # single time block (TC == T_pad)
    else:
        TC = 128                    # lane-aligned time block
    T_pad = _round_up(T, TC)

    nb16 = _round_up(B, 16) // 16
    if B >= 32:                     # keep >=2 batch blocks (both v7x cores busy)
        Bb = 16 * max(1, min(4, nb16 // 2))
    else:
        Bb = 16 * max(1, min(4, nb16))
    B_pad = _round_up(B, Bb)

    # ---- framing: gather directly into time-major (T, B, W), bf16 -----------
    t_idx = jnp.arange(T, dtype=jnp.int32)[:, None, None] * hop_len
    b_idx = jnp.arange(B, dtype=jnp.int32)[None, :, None] * L
    w_idx = jnp.arange(W, dtype=jnp.int32)[None, None, :]
    frames = x.reshape(-1)[b_idx + t_idx + w_idx].astype(jnp.bfloat16)  # (T,B,W)
    frames = jnp.pad(frames, ((0, T_pad - T), (0, B_pad - B), (0, 0)))
    frames2d = frames.reshape(T_pad * B_pad, W)

    # ---- kernel 1: STFT magnitude, row-tiled, pipelined ---------------------
    total_rows = T_pad * B_pad                       # multiple of 128
    RB = 512 if total_rows % 512 == 0 else (256 if total_rows % 256 == 0 else 128)
    RB = min(RB, total_rows)

    mag = pl.pallas_call(
        stft_mag_kernel,
        out_shape=jax.ShapeDtypeStruct((total_rows, FP), jnp.bfloat16),
        grid=(total_rows // RB,),
        in_specs=[
            pl.BlockSpec((RB, W), lambda i: (i, 0)),
            pl.BlockSpec((W, 2 * FP), lambda i: (0, 0)),
        ],
        out_specs=pl.BlockSpec((RB, FP), lambda i: (i, 0)),
        compiler_params=pltpu.CompilerParams(
            dimension_semantics=("parallel",)),
    )(frames2d, params["trig_win"])

    # lane-padded spectrogram, time-major; free reshape, no slicing / transpose
    spec_tb = mag.reshape(T_pad, B_pad, FP)

    # ---- kernel 2: GRU + head ----------------------------------------------
    w_args = (params["w_in3"], params["b_in3"],
              params["w_hh3"], params["b_hh3"],
              params["w_lin"], params["b_lin"])
    w_specs = [pl.BlockSpec(a.shape, lambda b, t: (0, 0)) for a in w_args]

    vmem_est = (2 * (TC * Bb * FP * 2 + TC * Bb * 2 * 4)
                + 2 * 4 * sum(int(np.prod(a.shape)) for a in w_args)
                + 4 * (TC * Bb * 3 * Hp + TC * Bb * Hp + Bb * Hp))
    vmem_limit = int(min(64 * 2 ** 20, max(16 * 2 ** 20, 2 * vmem_est)))

    out_pad = pl.pallas_call(
        gru_head_kernel,
        out_shape=jax.ShapeDtypeStruct((T_pad, B_pad, 2), jnp.float32),
        grid=(B_pad // Bb, T_pad // TC),
        in_specs=[pl.BlockSpec((TC, Bb, FP), lambda b, t: (t, b, 0))] + w_specs,
        out_specs=pl.BlockSpec((TC, Bb, 2), lambda b, t: (t, b, 0)),
        scratch_shapes=[
            pltpu.VMEM((TC, Bb, 3 * Hp), jnp.float32),   # input projections
            pltpu.VMEM((TC, Bb, Hp), jnp.float32),       # hidden states
            pltpu.VMEM((Bb, Hp), jnp.float32),           # hidden carry over T
        ],
        compiler_params=pltpu.CompilerParams(
            dimension_semantics=("parallel", "arbitrary"),
            vmem_limit_bytes=vmem_limit),
    )(spec_tb, *w_args)

    out = jnp.swapaxes(out_pad[:T, :B, :], 0, 1)         # (B, T, 2)
    # torch .squeeze(1): only drops the time axis when T == 1
    if out.shape[1] == 1:
        out = out[:, 0, :]
    return out


# ----------------------------------------------------------------------------
# Deterministic parameter initialization (matches the module's shapes).
# Gate order is PyTorch's (r, z, n); each gate gets a 128-aligned lane band.
# ----------------------------------------------------------------------------
def make_params(key, *, n_fft, win_len):
    W = win_len
    F = n_fft // 2 + 1
    FP = _round_up(F, 128)
    H = F // 2
    Hp = _round_up(H, 128)

    # hann window (periodic, like torch.hann_window default)
    n = np.arange(W)
    window = (0.5 * (1.0 - np.cos(2.0 * np.pi * n / W))).astype(np.float32)
    k = np.arange(F)
    ang = 2.0 * np.pi * np.outer(n, k) / n_fft                 # (W, F)
    cosm = np.cos(ang).astype(np.float32)
    sinm = (-np.sin(ang)).astype(np.float32)

    trig = np.zeros((W, 2 * FP), np.float32)
    trig[:, :F] = window[:, None] * cosm                       # window folded in
    trig[:, FP:FP + F] = window[:, None] * sinm

    ks = jax.random.split(key, 6)
    stdv = 1.0 / np.sqrt(H)
    w_ih = np.asarray(jax.random.uniform(ks[0], (3 * H, F), jnp.float32, -stdv, stdv))
    w_hh = np.asarray(jax.random.uniform(ks[1], (3 * H, H), jnp.float32, -stdv, stdv))
    b_ih = np.asarray(jax.random.uniform(ks[2], (3 * H,), jnp.float32, -stdv, stdv))
    b_hh = np.asarray(jax.random.uniform(ks[3], (3 * H,), jnp.float32, -stdv, stdv))
    w_lin = np.asarray(jax.random.uniform(ks[4], (2, H), jnp.float32, -stdv, stdv))
    b_lin = np.asarray(jax.random.uniform(ks[5], (2,), jnp.float32, -stdv, stdv))

    # packed + lane-padded weights for the kernel
    w_in3 = np.zeros((FP, 3 * Hp), np.float32)
    w_hh3 = np.zeros((Hp, 3 * Hp), np.float32)
    b_in3 = np.zeros((1, 3 * Hp), np.float32)
    b_hh3 = np.zeros((1, 3 * Hp), np.float32)
    for g in range(3):
        w_in3[:F, g * Hp:g * Hp + H] = w_ih[g * H:(g + 1) * H, :].T
        w_hh3[:H, g * Hp:g * Hp + H] = w_hh[g * H:(g + 1) * H, :].T
        b_in3[0, g * Hp:g * Hp + H] = b_ih[g * H:(g + 1) * H]
        b_hh3[0, g * Hp:g * Hp + H] = b_hh[g * H:(g + 1) * H]
    w_linp = np.zeros((Hp, 2), np.float32)
    w_linp[:H, :] = w_lin.T

    return {
        # kernel-side
        "trig_win": jnp.asarray(trig, dtype=jnp.bfloat16),     # (W, 2*FP)
        "w_in3": jnp.asarray(w_in3), "b_in3": jnp.asarray(b_in3),
        "w_hh3": jnp.asarray(w_hh3), "b_hh3": jnp.asarray(b_hh3),
        "w_lin": jnp.asarray(w_linp), "b_lin": jnp.asarray(b_lin[None, :]),
        # reference-side (unpadded, f32)
        "window": jnp.asarray(window)[None, :],                # (1, W)
        "cos": jnp.asarray(cosm), "sin": jnp.asarray(sinm),    # (W, F)
        "ref_w_in3": jnp.asarray(w_ih.T),                      # (F, 3H)
        "ref_w_hh3": jnp.asarray(w_hh.T),                      # (H, 3H)
        "ref_b_in3": jnp.asarray(b_ih[None, :]),
        "ref_b_hh3": jnp.asarray(b_hh[None, :]),
        "ref_w_lin": jnp.asarray(w_lin.T),                     # (H, 2)
        "ref_b_lin": jnp.asarray(b_lin[None, :]),
    }


# ----------------------------------------------------------------------------
# Pure-JAX reference (full f32, HIGHEST precision) for the correctness check
# ----------------------------------------------------------------------------
def vad_reference(x, params, *, n_fft, win_len, hop_len):
    B, L = x.shape
    W = win_len
    F = n_fft // 2 + 1
    H = F // 2
    T = (L - W) // hop_len + 1
    idx = jnp.arange(T)[:, None] * hop_len + jnp.arange(W)[None, :]
    frames = x[:, idx].astype(jnp.float32)                     # (B, T, W)
    fw = frames * params["window"][0]
    re = jnp.einsum("btw,wf->btf", fw, params["cos"], precision=HIGH)
    im = jnp.einsum("btw,wf->btf", fw, params["sin"], precision=HIGH)
    spec = jnp.sqrt(re * re + im * im + 1e-9)                  # (B, T, F)

    x3 = jnp.einsum("btf,fg->btg", spec, params["ref_w_in3"],
                    precision=HIGH) + params["ref_b_in3"]      # (B, T, 3H)
    h = jnp.zeros((B, H), jnp.float32)
    outs = []
    for t in range(T):
        hh = jnp.dot(h, params["ref_w_hh3"], precision=HIGH) + params["ref_b_hh3"]
        r = jax.nn.sigmoid(x3[:, t, :H] + hh[:, :H])
        z = jax.nn.sigmoid(x3[:, t, H:2 * H] + hh[:, H:2 * H])
        nn_ = jnp.tanh(x3[:, t, 2 * H:] + r * hh[:, 2 * H:])
        h = (1.0 - z) * nn_ + z * h
        logits = jnp.dot(h, params["ref_w_lin"], precision=HIGH) + params["ref_b_lin"]
        outs.append(jax.nn.softmax(logits, axis=-1))
    out = jnp.stack(outs, axis=1)                              # (B, T, 2)
    if out.shape[1] == 1:
        out = out[:, 0, :]
    return out


if __name__ == "__main__":
    # Small, forward-consistent shapes: n_fft = win_len = 32 -> F = 17, H = 8.
    # Note: the torch module's hidden_size arg is unused by forward (the GRU
    # width is input_size // 2), so it is unused here as well.
    n_fft, win_len, hop_len, hidden_size = 32, 32, 16, 64
    B, L = 2, 160                                              # -> T = 9 frames

    key = jax.random.PRNGKey(0)
    k_x, k_p = jax.random.split(key)
    x = jax.random.normal(k_x, (B, L), jnp.float32)
    params = make_params(k_p, n_fft=n_fft, win_len=win_len)

    out = vad_forward(x, params, n_fft=n_fft, win_len=win_len, hop_len=hop_len)
    out = jax.block_until_ready(out)

    ref = vad_reference(x, params, n_fft=n_fft, win_len=win_len, hop_len=hop_len)
    assert out.shape == ref.shape, (out.shape, ref.shape)
    # Kernel streams bf16 operands into default-precision (single-pass bf16,
    # f32-accumulate) MXU matmuls; reference is full f32 HIGHEST.
    np.testing.assert_allclose(np.asarray(out), np.asarray(ref),
                               rtol=2e-2, atol=2e-2)
    print("KERNEL_OK")
</pallas_src>

<mosaic_0001>
module attributes {stable_mosaic.version = 11 : i64} {
  func.func @stft_mag_kernel(%arg0: i32, %arg1: memref<256x32xbf16, #tpu.memory_space<vmem>>, %arg2: memref<32x256xbf16, #tpu.memory_space<vmem>>, %arg3: memref<256x128xbf16, #tpu.memory_space<vmem>>) attributes {dimension_semantics = [#tpu.dimension_semantics<parallel>], iteration_bounds = array<i64: 1>, scalar_prefetch = 0 : i64, scratch_operands = 0 : i64, tpu.core_type = #tpu.core_type<tc>, window_params = [{transform_indices = @transform_0, window_bounds = array<i64: 256, 32>}, {pipeline_mode = #tpu.pipeline_mode<synchronous>, transform_indices = @transform_1, window_bounds = array<i64: 32, 256>}, {transform_indices = @transform_2, window_bounds = array<i64: 256, 128>}]} {
    %c0 = arith.constant 0 : index
    %c0_0 = arith.constant 0 : index
    %0 = vector.load %arg1[%c0, %c0_0] : memref<256x32xbf16, #tpu.memory_space<vmem>>, vector<256x32xbf16>
    %c0_1 = arith.constant 0 : index
    %c0_2 = arith.constant 0 : index
    %1 = vector.load %arg2[%c0_1, %c0_2] : memref<32x256xbf16, #tpu.memory_space<vmem>>, vector<32x256xbf16>
    %cst = arith.constant dense<0.000000e+00> : vector<256x256xf32>
    %2 = tpu.matmul %0, %1, %cst {dimension_numbers = #tpu.dot_dimension_numbers<[1], [0], [0], [1], [0, 0, 1, 1], [], []>} : vector<256x32xbf16>, vector<32x256xbf16>, vector<256x256xf32> -> vector<256x256xf32>
    %3 = vector.extract_strided_slice %2 {offsets = [0, 0], sizes = [256, 128], strides = [1, 1]} : vector<256x256xf32> to vector<256x128xf32>
    %4 = vector.extract_strided_slice %2 {offsets = [0, 128], sizes = [256, 128], strides = [1, 1]} : vector<256x256xf32> to vector<256x128xf32>
    %5 = arith.mulf %3, %3 : vector<256x128xf32>
    %6 = arith.mulf %4, %4 : vector<256x128xf32>
    %7 = arith.addf %5, %6 : vector<256x128xf32>
    %cst_3 = arith.constant 9.99999971E-10 : f32
    %8 = vector.broadcast %cst_3 : f32 to vector<256x128xf32>
    %9 = arith.addf %7, %8 : vector<256x128xf32>
    %10 = math.sqrt %9 : vector<256x128xf32>
    %11 = arith.truncf %10 : vector<256x128xf32> to vector<256x128xbf16>
    %c0_4 = arith.constant 0 : index
    %c0_5 = arith.constant 0 : index
    %12 = vector.load %arg3[%c0_4, %c0_5] : memref<256x128xbf16, #tpu.memory_space<vmem>>, vector<256x128xbf16>
    tpu.vector_store %arg3[%c0_4, %c0_5], %11 {strides = array<i32>} : memref<256x128xbf16, #tpu.memory_space<vmem>>, vector<256x128xbf16>,
    return
  }
  func.func @transform_0(%arg0: i32) -> (i32, i32) {
    %c0_i32 = arith.constant 0 : i32
    %c0_i32_0 = arith.constant 0 : i32
    return %arg0, %c0_i32 : i32, i32
  }
  func.func @transform_1(%arg0: i32) -> (i32, i32) {
    %c0_i32 = arith.constant 0 : i32
    %c0_i32_0 = arith.constant 0 : i32
    %c0_i32_1 = arith.constant 0 : i32
    return %c0_i32, %c0_i32_0 : i32, i32
  }
  func.func @transform_2(%arg0: i32) -> (i32, i32) {
    %c0_i32 = arith.constant 0 : i32
    %c0_i32_0 = arith.constant 0 : i32
    return %arg0, %c0_i32 : i32, i32
  }
}

</mosaic_0001>

<bundles_post_ra>
// kernel: tpu_custom_call.1
= control target key start
LH: loop header
LB: loop body
LE: loop exit
PB: predicated region body
PF: predicated region fallthrough
CT: control target
= control target key end

     0   :  { %v1232_v2 = vmov 0   ;;  %vm149_vm0 = vcmask 261120   ;;  %s1789_s0 = inlined_call_operand.vmem [shape: bf16[256,32], index: 0, kind: input, shape index: {}]   ;;  %s1790_s1 = inlined_call_operand.vmem [shape: bf16[32,256], index: 1, kind: input, shape index: {}]   ;;  %s1791_s2 = inlined_call_operand.hbm [shape: bf16[256,128], index: 2, kind: output, shape index: {}]  }
   0x1   :  { %v1122_v0 = vld [vmem:[%s1790_s1 + $0x4] ss:$8 sps:$4 sm:$0xff]   ;;  %v1124_v1 = vld [vmem:[%s1790_s1] ss:$8 sps:$4 sm:$0xff]   ;;  %230 = vmatprep.mubr.bf16.mxu0 %v1232_v2  ;;  %310 = vmatprep.mubr.bf16.mxu1 %v1232_v2  ;;  %v1125_v3 = vld [vmem:[%s1790_s1 + $0x14] ss:$8 sps:$4 sm:$0xff]  }
   0x2   :  { %198 = vmatprep.subr.bf16.mxu0 %v1122_v0  ;;  %1114 = vmatprep.subr.bf16.mxu1 %v1122_v0  ;;  %v1127_v4 = vld [vmem:[%s1790_s1 + $0x10] ss:$8 sps:$4 sm:$0xff]   ;;  %v1128_v5 = vld [vmem:[%s1789_s0] sm:$0xff]   ;;  %v1130_v7 = vld [vmem:[%s1789_s0 + $0x8] sm:$0xff]  }
   0x3   :  { %199 = vmatpush1.bf16.msra.mxu0 %v1124_v1  ;;  %1116 = vmatpush1.bf16.msra.mxu1 %v1124_v1  ;;  %v1129_v6 = vld [vmem:[%s1789_s0 + $0x40] sm:$0xff]   ;;  %v1131_v8 = vld [vmem:[%s1789_s0 + $0x48] sm:$0xff]  }
   0x4   :  { %200 = vmatprep.subr.bf16.mxu0 %v1125_v3  ;;  %1115 = vmatprep.subr.bf16.mxu1 %v1125_v3 }
   0x7   :  { %201 = vmatpush1.bf16.msra.mxu0 %v1127_v4  ;;  %1117 = vmatpush1.bf16.msra.mxu1 %v1127_v4 }
   0xa   :  { %939 = vmatmul.mubr.msk.bf16.vlgmr.msra.gmra.mrb[0].mxu0 %vm149_vm0, %v1128_v5  ;;  %947 = vmatmul.mubr.msk.bf16.vlgmr.msra.gmra.mrb[0].mxu1 %vm149_vm0, %v1129_v6 }
   0xb   :  { %240 = vmatprep.mubr.bf16.mxu0 %v1232_v2  ;;  %320 = vmatprep.mubr.bf16.mxu1 %v1232_v2 }
  0x12   :  { %940 = vmatmul.mubr.msk.bf16.gmra.mrb[4].mxu0 %vm149_vm0, %v1130_v7  ;;  %948 = vmatmul.mubr.msk.bf16.gmra.mrb[4].mxu1 %vm149_vm0, %v1131_v8 }
  0x13   :  { %7 = vsyncpa [#allocation3], 0  ;;  %250 = vmatprep.mubr.bf16.mxu0 %v1232_v2  ;;  %330 = vmatprep.mubr.bf16.mxu1 %v1232_v2  ;;  %v1132_v9 = vld [vmem:[%s1789_s0 + $0x10] sm:$0xff]   ;;  %v1134_v11 = vld [vmem:[%s1789_s0 + $0x18] sm:$0xff]  }
  0x14   :  { %v1133_v10 = vld [vmem:[%s1789_s0 + $0x50] sm:$0xff]   ;;  %v1135_v12 = vld [vmem:[%s1789_s0 + $0x58] sm:$0xff]   ;;  %v1136_v13 = vld [vmem:[%s1789_s0 + $0x20] sm:$0xff]  }
  0x15   :  { %v1137_v14 = vld [vmem:[%s1789_s0 + $0x60] sm:$0xff]   ;;  %v1138_v15 = vld [vmem:[%s1789_s0 + $0x28] sm:$0xff]   ;;  %v1140_v17 = vld [vmem:[%s1789_s0 + $0x30] sm:$0xff]  }
  0x16   :  { %v1139_v16 = vld [vmem:[%s1789_s0 + $0x68] sm:$0xff]   ;;  %v1141_v18 = vld [vmem:[%s1789_s0 + $0x70] sm:$0xff]   ;;  %v1142_v19 = vld [vmem:[%s1789_s0 + $0x38] sm:$0xff]  }
  0x17   :  { %v1143_v20 = vld [vmem:[%s1789_s0 + $0x78] sm:$0xff]   ;;  %s1233_s0 = smov [#allocation2]  }
  0x18   :  { %s908_s20 = sshll.u32 %s1233_s0, 4  ;;  %s909_s20 = int_to_ptr.vmem [resolvable:$true] %s908_s20 }
  0x19   :  { %s1208_s1 = scalar_lea.vmem %s909_s20, 2048  ;;  %p1213_p1 = scmp.lt.s32.totalorder %s909_s20, %s909_s20 }
  0x1a   :  { %941 = vmatmul.mubr.msk.bf16.gmra.mrb[8].mxu0 %vm149_vm0, %v1132_v9  ;;  %949 = vmatmul.mubr.msk.bf16.gmra.mrb[8].mxu1 %vm149_vm0, %v1133_v10  ;;  %p1209_p0 = scmp.ne.s32.totalorder %s909_s20, %s1208_s1  ;;  %p1214_p2 = scmp.lt.s32.totalorder %s1208_s1, %s1208_s1 }
  0x1b   :  { %260 = vmatprep.mubr.bf16.mxu0 %v1232_v2  ;;  %340 = vmatprep.mubr.bf16.mxu1 %v1232_v2 }
  0x1c   :  { %p1215_p3 = por %p1214_p2, %p1213_p1 }
  0x1e   :  { %p1216_p4 = pnand %p1215_p3, %p1209_p0 }
  0x22   :  { %942 = vmatmul.mubr.msk.bf16.gmra.mrb[12].mxu0 %vm149_vm0, %v1134_v11  ;;  %950 = vmatmul.mubr.msk.bf16.gmra.mrb[12].mxu1 %vm149_vm0, %v1135_v12 }
  0x23   :  { %270 = vmatprep.mubr.bf16.mxu0 %v1232_v2  ;;  %350 = vmatprep.mubr.bf16.mxu1 %v1232_v2 }
  0x2a   :  { %943 = vmatmul.mubr.msk.bf16.gmra.mrb[16].mxu0 %vm149_vm0, %v1136_v13  ;;  %951 = vmatmul.mubr.msk.bf16.gmra.mrb[16].mxu1 %vm149_vm0, %v1137_v14 }
  0x2b   :  { %280 = vmatprep.mubr.bf16.mxu0 %v1232_v2  ;;  %360 = vmatprep.mubr.bf16.mxu1 %v1232_v2 }
  0x32   :  { %944 = vmatmul.mubr.msk.bf16.gmra.mrb[20].mxu0 %vm149_vm0, %v1138_v15  ;;  %952 = vmatmul.mubr.msk.bf16.gmra.mrb[20].mxu1 %vm149_vm0, %v1139_v16 }
  0x33   :  { %290 = vmatprep.mubr.bf16.mxu0 %v1232_v2  ;;  %370 = vmatprep.mubr.bf16.mxu1 %v1232_v2 }
  0x3a   :  { %945 = vmatmul.mubr.msk.bf16.gmra.mrb[24].mxu0 %vm149_vm0, %v1140_v17  ;;  %953 = vmatmul.mubr.msk.bf16.gmra.mrb[24].mxu1 %vm149_vm0, %v1141_v18 }
  0x3b   :  { %300 = vmatprep.mubr.bf16.mxu0 %v1232_v2  ;;  %380 = vmatprep.mubr.bf16.mxu1 %v1232_v2 }
  0x42   :  { %946 = vmatmul.mubr.msk.bf16.gmra.mrb[28].mxu0 %vm149_vm0, %v1142_v19  ;;  %954 = vmatmul.mubr.msk.bf16.gmra.mrb[28].mxu1 %vm149_vm0, %v1143_v20 }
  0xdd   :  { %v232_v21 = vpop.f32.mrb[0].mxu0  ;;  %v312_v22 = vpop.f32.mrb[0].mxu1 }
  0xde   :  { %v391_v23 = vmul.f32 %v232_v21, %v232_v21  ;;  %v407_v24 = vmul.f32 %v312_v22, %v312_v22  ;;  %v234_v25 = vpop.f32.mrb[1].mxu0  ;;  %v314_v26 = vpop.f32.mrb[1].mxu1 }
  0xdf   :  { %v423_v27 = vmul.f32 %v234_v25, %v234_v25  ;;  %v439_v28 = vmul.f32 %v314_v26, %v314_v26  ;;  %v236_v29 = vpop.f32.mrb[2].mxu0  ;;  %v316_v30 = vpop.f32.mrb[2].mxu1 }
  0xe0   :  { %v392_v31 = vmul.f32 %v236_v29, %v236_v29  ;;  %v408_v32 = vmul.f32 %v316_v30, %v316_v30  ;;  %v238_v33 = vpop.f32.mrb[3].mxu0  ;;  %v318_v34 = vpop.f32.mrb[3].mxu1 }
  0xe1   :  { %v455_v35 = vadd.f32 %v423_v27, %v391_v23  ;;  %v471_v36 = vadd.f32 %v439_v28, %v407_v24  ;;  %v424_v37 = vmul.f32 %v238_v33, %v238_v33  ;;  %v440_v38 = vmul.f32 %v318_v34, %v318_v34 }
  0xe3   :  { %v1327_v39 = vadd.f32 1e-09, %v455_v35  ;;  %v1329_v40 = vadd.f32 1e-09, %v471_v36  ;;  %v456_v41 = vadd.f32 %v424_v37, %v392_v31  ;;  %v472_v42 = vadd.f32 %v440_v38, %v408_v32 }
  0xe5   :  { %1144 = vrsqrt.f32 %v1327_v39  ;;  %v242_v43 = vpop.f32.mrb[4].mxu0  ;;  %v322_v44 = vpop.f32.mrb[4].mxu1  ;;  %v1333_v47 = vadd.f32 1e-09, %v456_v41  ;;  %v1335_v48 = vadd.f32 1e-09, %v472_v42 }
  0xe6   :  { %1146 = vrsqrt.f32 %v1329_v40  ;;  %v244_v45 = vpop.f32.mrb[5].mxu0  ;;  %v324_v46 = vpop.f32.mrb[5].mxu1  ;;  %v393_v49 = vmul.f32 %v242_v43, %v242_v43  ;;  %v409_v50 = vmul.f32 %v322_v44, %v322_v44  ;;  %vm521_vm1 = vcmp.eq.f32.partialorder %v1327_v39, inf }
  0xe7   :  { %v246_v51 = vpop.f32.mrb[6].mxu0  ;;  %v326_v52 = vpop.f32.mrb[6].mxu1  ;;  %v425_v53 = vmul.f32 %v244_v45, %v244_v45  ;;  %v441_v54 = vmul.f32 %v324_v46, %v324_v46  ;;  %1148 = vrsqrt.f32 %v1333_v47  ;;  %vm523_vm2 = vcmp.eq.f32.partialorder %v1327_v39, 0.0 }
  0xe8   :  { %v248_v55 = vpop.f32.mrb[7].mxu0  ;;  %v328_v56 = vpop.f32.mrb[7].mxu1  ;;  %v394_v57 = vmul.f32 %v246_v51, %v246_v51  ;;  %v410_v58 = vmul.f32 %v326_v52, %v326_v52  ;;  %1150 = vrsqrt.f32 %v1335_v48  ;;  %v524_v8 = vand.u32 2147483648, %v1327_v39 }
  0xe9   :  { %v457_v59 = vadd.f32 %v425_v53, %v393_v49  ;;  %v473_v60 = vadd.f32 %v441_v54, %v409_v50  ;;  %v426_v61 = vmul.f32 %v248_v55, %v248_v55  ;;  %v442_v62 = vmul.f32 %v328_v56, %v328_v56 }
  0xea   :  { %vm633_vm3 = vcmp.eq.f32.partialorder %v1329_v40, inf  ;;  %vm635_vm4 = vcmp.eq.f32.partialorder %v1329_v40, 0.0  ;;  %v636_v13 = vand.u32 2147483648, %v1329_v40  ;;  %vm528_vm5 = vcmp.eq.f32.partialorder %v1333_v47, inf }
  0xeb   :  { %v1339_v63 = vadd.f32 1e-09, %v457_v59  ;;  %v1341_v0 = vadd.f32 1e-09, %v473_v60  ;;  %v458_v1 = vadd.f32 %v426_v61, %v394_v57  ;;  %v474_v2 = vadd.f32 %v442_v62, %v410_v58 }
  0xec   :  { %vm530_vm6 = vcmp.eq.f32.partialorder %v1333_v47, 0.0  ;;  %v531_v25 = vand.u32 2147483648, %v1333_v47  ;;  %vm640_vm7 = vcmp.eq.f32.partialorder %v1335_v48, inf  ;;  %vm642_vm8 = vcmp.eq.f32.partialorder %v1335_v48, 0.0 }
  0xed   :  { %v252_v3 = vpop.f32.mrb[8].mxu0  ;;  %v332_v4 = vpop.f32.mrb[8].mxu1  ;;  %1152 = vrsqrt.f32 %v1339_v63  ;;  %v1354_v17 = vadd.f32 1e-09, %v458_v1  ;;  %v1356_v18 = vadd.f32 1e-09, %v474_v2 }
  0xee   :  { %v254_v5 = vpop.f32.mrb[9].mxu0  ;;  %v334_v6 = vpop.f32.mrb[9].mxu1  ;;  %1154 = vrsqrt.f32 %v1341_v0  ;;  %v395_v19 = vmul.f32 %v252_v3, %v252_v3  ;;  %v411_v20 = vmul.f32 %v332_v4, %v332_v4  ;;  %v643_v30 = vand.u32 2147483648, %v1335_v48 }
  0xef   :  { %v1145_v7 = vpop.eup %1144  ;;  %v256_v9 = vpop.f32.mrb[10].mxu0  ;;  %v427_v21 = vmul.f32 %v254_v5, %v254_v5  ;;  %v443_v22 = vmul.f32 %v334_v6, %v334_v6  ;;  %1156 = vrsqrt.f32 %v1354_v17  ;;  %vm535_vm9 = vcmp.eq.f32.partialorder %v1339_v63, inf }
  0xf0   :  { %v336_v10 = vpop.f32.mrb[10].mxu1  ;;  %v1147_v11 = vpop.eup %1146  ;;  %v520_v12 = vmul.f32 %v1145_v7, %v1327_v39  ;;  %1158 = vrsqrt.f32 %v1356_v18  ;;  %v396_v31 = vmul.f32 %v256_v9, %v256_v9  ;;  %vm537_vm10 = vcmp.eq.f32.partialorder %v1339_v63, 0.0 }
  0xf1   :  { %v258_v14 = vpop.f32.mrb[11].mxu0  ;;  %v338_v15 = vpop.f32.mrb[11].mxu1  ;;  %v632_v16 = vmul.f32 %v1147_v11, %v1329_v40  ;;  %v459_v36 = vadd.f32 %v427_v21, %v395_v19  ;;  %v475_v37 = vadd.f32 %v443_v22, %v411_v20  ;;  %v412_v55 = vmul.f32 %v336_v10, %v336_v10 }
  0xf2   :  { %v1149_v23 = vpop.eup %1148  ;;  %v522_v24 = vsel %vm521_vm1, %v1327_v39, %v520_v12  ;;  %v428_v39 = vmul.f32 %v258_v14, %v258_v14  ;;  %v444_v57 = vmul.f32 %v338_v15, %v338_v15  ;;  %vm647_vm11 = vcmp.eq.f32.partialorder %v1341_v0, inf }
  0xf3   :  { %v1151_v26 = vpop.eup %1150  ;;  %v634_v27 = vsel %vm633_vm3, %v1329_v40, %v632_v16  ;;  %v527_v28 = vmul.f32 %v1149_v23, %v1333_v47  ;;  %v525_v34 = vsel %vm523_vm2, %v524_v8, %v522_v24  ;;  %v1389_v51 = vadd.f32 1e-09, %v459_v36 }
  0xf4   :  { %v639_v29 = vmul.f32 %v1151_v26, %v1335_v48  ;;  %v637_v42 = vsel %vm635_vm4, %v636_v13, %v634_v27  ;;  %v1391_v52 = vadd.f32 1e-09, %v475_v37  ;;  %v460_v56 = vadd.f32 %v428_v39, %v396_v31 }
  0xf5   :  { %v262_v32 = vpop.f32.mrb[12].mxu0  ;;  %v342_v33 = vpop.f32.mrb[12].mxu1  ;;  %v529_v35 = vsel %vm528_vm5, %v1333_v47, %v527_v28  ;;  %1160 = vrsqrt.f32 %v1389_v51  ;;  %vm649_vm12 = vcmp.eq.f32.partialorder %v1341_v0, 0.0  ;;  %v650_v61 = vand.u32 2147483648, %v1341_v0 }
  0xf6   :  { %v264_v38 = vpop.f32.mrb[13].mxu0  ;;  %v344_v41 = vpop.f32.mrb[13].mxu1  ;;  %v532_v43 = vsel %vm530_vm6, %v531_v25, %v529_v35  ;;  %v641_v44 = vsel %vm640_vm7, %v1335_v48, %v639_v29  ;;  %v538_v48 = vand.u32 2147483648, %v1339_v63  ;;  %1162 = vrsqrt.f32 %v1391_v52 }
  0xf7   :  { %v266_v45 = vpop.f32.mrb[14].mxu0  ;;  %v1385_v46 = vpop.f32.mrb[14].mxu1  ;;  %v1022_v49 = vpack.c.bf16 %v532_v43, %v525_v34  ;;  %v644_v50 = vsel %vm642_vm8, %v643_v30, %v641_v44  ;;  %vm542_vm13 = vcmp.eq.f32.partialorder %v1354_v17, inf  ;;  %v1406_v62 = vadd.f32 1e-09, %v460_v56 }
  0xf8   :  { %v268_v40 = vpop.f32.mrb[15].mxu0  ;;  %v1393_v53 = vpop.f32.mrb[15].mxu1  ;;  %v1062_v54 = vpack.c.bf16 %v644_v50, %v637_v42  ;;  %vm544_vm14 = vcmp.eq.f32.partialorder %v1354_v17, 0.0  ;;  %v545_v2 = vand.u32 2147483648, %v1354_v17  ;;  %vm654_vm15 = vcmp.eq.f32.partialorder %v1356_v18, inf }
  0xf9   :  { %v1153_v47 = vpop.eup %1152  ;;  %1023 = vst [vmem:[#allocation2] sm:$0xff] %v1022_v49   ;;  %v476_v3 = vadd.f32 %v444_v57, %v412_v55  ;;  %1164 = vrsqrt.f32 %v1406_v62  ;;  %v397_v8 = vmul.f32 %v262_v32, %v262_v32  ;;  %v657_v12 = vand.u32 2147483648, %v1356_v18 }
  0xfa   :  { %v1155_v58 = vpop.eup %1154  ;;  %v534_v59 = vmul.f32 %v1153_v47, %v1339_v63  ;;  %1106 = vst [vmem:[#allocation2 + $0x40] sm:$0xff] %v1062_v54   ;;  %v413_v14 = vmul.f32 %v342_v33, %v342_v33  ;;  %v429_v15 = vmul.f32 %v264_v38, %v264_v38  ;;  %v445_v23 = vmul.f32 %v344_v41, %v344_v41 }
  0xfb   :  { %v646_v60 = vmul.f32 %v1155_v58, %v1341_v0  ;;  %v1157_v1 = vpop.eup %1156  ;;  %v1423_v13 = vadd.f32 1e-09, %v476_v3  ;;  %v398_v28 = vmul.f32 %v266_v45, %v266_v45  ;;  %vm656_vm0 = vcmp.eq.f32.partialorder %v1356_v18, 0.0 }
  0xfc   :  { %v536_v6 = vsel %vm535_vm9, %v1339_v63, %v534_v59  ;;  %v541_v7 = vmul.f32 %v1157_v1, %v1354_v17  ;;  %v1159_v11 = vpop.eup %1158  ;;  %v461_v31 = vadd.f32 %v429_v15, %v397_v8  ;;  %v477_v63 = vadd.f32 %v445_v23, %v413_v14 }
  0xfd   :  { %v272_v4 = vpop.f32.mrb[16].mxu0  ;;  %v1411_v5 = vpop.f32.mrb[16].mxu1  ;;  %v648_v20 = vsel %vm647_vm11, %v1341_v0, %v646_v60  ;;  %v653_v22 = vmul.f32 %v1159_v11, %v1356_v18  ;;  %v539_v26 = vsel %vm537_vm10, %v538_v48, %v536_v6  ;;  %1166 = vrsqrt.f32 %v1423_v13 }
  0xfe   :  { %v1418_v9 = vpop.f32.mrb[17].mxu0  ;;  %v1420_v10 = vpop.f32.mrb[17].mxu1  ;;  %v543_v21 = vsel %vm542_vm13, %v1354_v17, %v541_v7  ;;  %v651_v32 = vsel %vm649_vm12, %v650_v61, %v648_v20  ;;  %v430_v34 = vmul.f32 %v268_v40, %v268_v40  ;;  %vm549_vm1 = vcmp.eq.f32.partialorder %v1389_v51, inf }
  0xff   :  { %v1425_v16 = vpop.f32.mrb[18].mxu0  ;;  %v1427_v19 = vpop.f32.mrb[18].mxu1  ;;  %v546_v27 = vsel %vm544_vm14, %v545_v2, %v543_v21  ;;  %v655_v30 = vsel %vm654_vm15, %v1356_v18, %v653_v22  ;;  %v1452_v36 = vadd.f32 1e-09, %v461_v31  ;;  %v414_v37 = vmul.f32 %v1385_v46, %v1385_v46 }
 0x100   :  { %v1436_v24 = vpop.f32.mrb[19].mxu0  ;;  %v1438_v25 = vpop.f32.mrb[19].mxu1  ;;  %v1027_v29 = vpack.c.bf16 %v546_v27, %v539_v26  ;;  %v658_v33 = vsel %vm656_vm0, %v657_v12, %v655_v30  ;;  %v1457_v41 = vadd.f32 1e-09, %v477_v63  ;;  %v462_v0 = vadd.f32 %v430_v34, %v398_v28 }
 0x101   :  { %v1161_v35 = vpop.eup %1160  ;;  %v1067_v17 = vpack.c.bf16 %v658_v33, %v651_v32  ;;  %v446_v42 = vmul.f32 %v1393_v53, %v1393_v53  ;;  %vm551_vm2 = vcmp.eq.f32.partialorder %v1389_v51, 0.0  ;;  %v552_v39 = vand.u32 2147483648, %v1389_v51 }
 0x102   :  { %1099 = vst [vmem:[#allocation2 + $0x8] sm:$0xff] %v1027_v29   ;;  %v1163_v38 = vpop.eup %1162  ;;  %v548_v18 = vmul.f32 %v1161_v35, %v1389_v51  ;;  %vm661_vm3 = vcmp.eq.f32.partialorder %v1391_v52, inf  ;;  %1168 = vrsqrt.f32 %v1452_v36  ;;  %v664_v50 = vand.u32 2147483648, %v1391_v52 }
 0x103   :  { %1107 = vst [vmem:[#allocation2 + $0x48] sm:$0xff] %v1067_v17   ;;  %v660_v49 = vmul.f32 %v1163_v38, %v1391_v52  ;;  %vm556_vm4 = vcmp.eq.f32.partialorder %v1406_v62, inf  ;;  %1170 = vrsqrt.f32 %v1457_v41  ;;  %v1165_v47 = vpop.eup %1164  ;;  %vm558_vm5 = vcmp.eq.f32.partialorder %v1406_v62, 0.0 }
 0x104   :  { %v550_v54 = vsel %vm549_vm1, %v1389_v51, %v548_v18  ;;  %v559_v55 = vand.u32 2147483648, %v1406_v62  ;;  %v399_v56 = vmul.f32 %v272_v4, %v272_v4  ;;  %v555_v59 = vmul.f32 %v1165_v47, %v1406_v62 }
 0x105   :  { %v1461_v43 = vpop.f32.mrb[20].mxu0  ;;  %v1463_v44 = vpop.f32.mrb[20].mxu1  ;;  %v1491_v48 = vadd.f32 1e-09, %v462_v0  ;;  %v478_v60 = vadd.f32 %v446_v42, %v414_v37  ;;  %v415_v61 = vmul.f32 %v1411_v5, %v1411_v5  ;;  %vm668_vm6 = vcmp.eq.f32.partialorder %v1423_v13, inf }
 0x106   :  { %v1469_v45 = vpop.f32.mrb[21].mxu0  ;;  %v1471_v46 = vpop.f32.mrb[21].mxu1  ;;  %v671_v1 = vand.u32 2147483648, %v1423_v13  ;;  %v431_v2 = vmul.f32 %v1418_v9, %v1418_v9  ;;  %v447_v3 = vmul.f32 %v1420_v10, %v1420_v10  ;;  %v553_v6 = vsel %vm551_vm2, %v552_v39, %v550_v54 }
 0x107   :  { %v1477_v40 = vpop.f32.mrb[22].mxu0  ;;  %v1479_v53 = vpop.f32.mrb[22].mxu1  ;;  %v662_v7 = vsel %vm661_vm3, %v1391_v52, %v660_v49  ;;  %v557_v5 = vsel %vm556_vm4, %v1406_v62, %v555_v59  ;;  %1172 = vrsqrt.f32 %v1491_v48  ;;  %v1513_v10 = vadd.f32 1e-09, %v478_v60 }
 0x108   :  { %v1486_v57 = vpop.f32.mrb[23].mxu0  ;;  %v1488_v58 = vpop.f32.mrb[23].mxu1  ;;  %v560_v8 = vsel %vm558_vm5, %v559_v55, %v557_v5  ;;  %v400_v51 = vmul.f32 %v1425_v16, %v1425_v16  ;;  %v463_v12 = vadd.f32 %v431_v2, %v399_v56  ;;  %v479_v14 = vadd.f32 %v447_v3, %v415_v61 }
 0x109   :  { %v1167_v4 = vpop.eup %1166  ;;  %v1032_v11 = vpack.c.bf16 %v560_v8, %v553_v6  ;;  %v432_v15 = vmul.f32 %v1436_v24, %v1436_v24  ;;  %vm663_vm7 = vcmp.eq.f32.partialorder %v1391_v52, 0.0  ;;  %vm670_vm8 = vcmp.eq.f32.partialorder %v1423_v13, 0.0 }
 0x10a   :  { %v667_v9 = vmul.f32 %v1167_v4, %v1423_v13  ;;  %1174 = vrsqrt.f32 %v1513_v10  ;;  %v665_v23 = vsel %vm663_vm7, %v664_v50, %v662_v7  ;;  %v1533_v26 = vadd.f32 1e-09, %v463_v12 }
 0x10b   :  { %1100 = vst [vmem:[#allocation2 + $0x10] sm:$0xff] %v1032_v11   ;;  %v1535_v27 = vadd.f32 1e-09, %v479_v14  ;;  %v464_v30 = vadd.f32 %v432_v15, %v400_v51  ;;  %v448_v31 = vmul.f32 %v1438_v25, %v1438_v25  ;;  %vm563_vm9 = vcmp.eq.f32.partialorder %v1452_v36, inf }
 0x10c   :  { %v669_v62 = vsel %vm668_vm6, %v1423_v13, %v667_v9  ;;  %v1169_v28 = vpop.eup %1168  ;;  %v416_v13 = vmul.f32 %v1427_v19, %v1427_v19  ;;  %vm565_vm10 = vcmp.eq.f32.partialorder %v1452_v36, 0.0  ;;  %1176 = vrsqrt.f32 %v1533_v26 }
 0x10d   :  { %v1519_v20 = vpop.f32.mrb[24].mxu0  ;;  %v1521_v21 = vpop.f32.mrb[24].mxu1  ;;  %v672_v24 = vsel %vm670_vm8, %v671_v1, %v669_v62  ;;  %v562_v34 = vmul.f32 %v1169_v28, %v1452_v36  ;;  %v566_v19 = vand.u32 2147483648, %v1452_v36  ;;  %vm675_vm11 = vcmp.eq.f32.partialorder %v1457_v41, inf }
 0x10e   :  { %v1529_v16 = vpop.f32.mrb[25].mxu0  ;;  %v1531_v22 = vpop.f32.mrb[25].mxu1  ;;  %v1072_v29 = vpack.c.bf16 %v672_v24, %v665_v23  ;;  %vm677_vm12 = vcmp.eq.f32.partialorder %v1457_v41, 0.0  ;;  %1178 = vrsqrt.f32 %v1535_v27  ;;  %v678_v25 = vand.u32 2147483648, %v1457_v41 }
 0x10f   :  { %v1537_v52 = vpop.f32.mrb[26].mxu0  ;;  %v1543_v32 = vpop.f32.mrb[26].mxu1  ;;  %vm570_vm13 = vcmp.eq.f32.partialorder %v1491_v48, inf  ;;  %vm572_vm14 = vcmp.eq.f32.partialorder %v1491_v48, 0.0  ;;  %v1560_v17 = vadd.f32 1e-09, %v464_v30  ;;  %v480_v18 = vadd.f32 %v448_v31, %v416_v13 }
 0x110   :  { %v1545_v33 = vpop.f32.mrb[27].mxu0  ;;  %v1171_v63 = vpop.eup %1170  ;;  %1108 = vst [vmem:[#allocation2 + $0x50] sm:$0xff] %v1072_v29   ;;  %v573_v38 = vand.u32 2147483648, %v1491_v48  ;;  %vm682_vm15 = vcmp.eq.f32.partialorder %v1513_v10, inf  ;;  %v564_v42 = vsel %vm563_vm9, %v1452_v36, %v562_v34  ;;  %vm684_vm0 = vcmp.eq.f32.partialorder %v1513_v10, 0.0 }
 0x111   :  { %v1551_v35 = vpop.f32.mrb[27].mxu1  ;;  %v674_v37 = vmul.f32 %v1171_v63, %v1457_v41  ;;  %v1173_v0 = vpop.eup %1172  ;;  %1180 = vrsqrt.f32 %v1560_v17  ;;  %v401_v39 = vmul.f32 %v1461_v43, %v1461_v43  ;;  %v1577_v54 = vadd.f32 1e-09, %v480_v18 }
 0x112   :  { %v569_v47 = vmul.f32 %v1173_v0, %v1491_v48  ;;  %v417_v55 = vmul.f32 %v1463_v44, %v1463_v44  ;;  %v433_v56 = vmul.f32 %v1469_v45, %v1469_v45  ;;  %v685_v43 = vand.u32 2147483648, %v1513_v10 }
 0x113   :  { %v449_v61 = vmul.f32 %v1471_v46, %v1471_v46  ;;  %v402_v1 = vmul.f32 %v1477_v40, %v1477_v40  ;;  %v434_v2 = vmul.f32 %v1486_v57, %v1486_v57  ;;  %v676_v4 = vsel %vm675_vm11, %v1457_v41, %v674_v37 }
 0x114   :  { %v1175_v45 = vpop.eup %1174  ;;  %v571_v6 = vsel %vm570_vm13, %v1491_v48, %v569_v47  ;;  %vm577_vm1 = vcmp.eq.f32.partialorder %v1533_v26, inf  ;;  %1182 = vrsqrt.f32 %v1577_v54  ;;  %v567_v57 = vsel %vm565_vm10, %v566_v19, %v564_v42 }
 0x115   :  { %v1572_v49 = vpop.f32.mrb[28].mxu0  ;;  %v1574_v50 = vpop.f32.mrb[28].mxu1  ;;  %v574_v7 = vsel %vm572_vm14, %v573_v38, %v571_v6  ;;  %v681_v5 = vmul.f32 %v1175_v45, %v1513_v10  ;;  %v465_v8 = vadd.f32 %v433_v56, %v401_v39  ;;  %vm579_vm2 = vcmp.eq.f32.partialorder %v1533_v26, 0.0 }
 0x116   :  { %v1583_v59 = vpop.f32.mrb[29].mxu0  ;;  %v1585_v60 = vpop.f32.mrb[29].mxu1  ;;  %v1037_v9 = vpack.c.bf16 %v574_v7, %v567_v57  ;;  %v481_v51 = vadd.f32 %v449_v61, %v417_v55  ;;  %v466_v11 = vadd.f32 %v434_v2, %v402_v1  ;;  %v679_v14 = vsel %vm677_vm12, %v678_v25, %v676_v4 }
 0x117   :  { %v1594_v3 = vpop.f32.mrb[30].mxu0  ;;  %v1596_v44 = vpop.f32.mrb[30].mxu1  ;;  %v683_v36 = vsel %vm682_vm15, %v1513_v10, %v681_v5  ;;  %v580_v15 = vand.u32 2147483648, %v1533_v26  ;;  %v1622_v48 = vadd.f32 1e-09, %v465_v8  ;;  %v418_v13 = vmul.f32 %v1479_v53, %v1479_v53 }
 0x118   :  { %v1606_v46 = vpop.f32.mrb[31].mxu0  ;;  %v1608_v40 = vpop.f32.mrb[31].mxu1  ;;  %1101 = vst [vmem:[#allocation2 + $0x18] sm:$0xff] %v1037_v9   ;;  %v686_v23 = vsel %vm684_vm0, %v685_v43, %v683_v36  ;;  %v1627_v28 = vadd.f32 1e-09, %v481_v51  ;;  %v450_v30 = vmul.f32 %v1488_v58, %v1488_v58  ;;  %vm689_vm3 = vcmp.eq.f32.partialorder %v1535_v27, inf }
 0x119   :  { %v1177_v12 = vpop.eup %1176  ;;  %v1629_v29 = vadd.f32 1e-09, %v466_v11  ;;  %v1077_v41 = vpack.c.bf16 %v686_v23, %v679_v14  ;;  %1184 = vrsqrt.f32 %v1622_v48  ;;  %v692_v34 = vand.u32 2147483648, %v1535_v27 }
 0x11a   :  { %v1179_v62 = vpop.eup %1178  ;;  %v576_v24 = vmul.f32 %v1177_v12, %v1533_v26  ;;  %1186 = vrsqrt.f32 %v1627_v28  ;;  %vm584_vm4 = vcmp.eq.f32.partialorder %v1560_v17, inf  ;;  %vm586_vm5 = vcmp.eq.f32.partialorder %v1560_v17, 0.0 }
 0x11b   :  { %v688_v31 = vmul.f32 %v1179_v62, %v1535_v27  ;;  %v1181_v63 = vpop.eup %1180  ;;  %1109 = vst [vmem:[#allocation2 + $0x58] sm:$0xff] %v1077_v41   ;;  %v587_v53 = vand.u32 2147483648, %v1560_v17  ;;  %1188 = vrsqrt.f32 %v1629_v29  ;;  %v403_v19 = vmul.f32 %v1519_v20, %v1519_v20 }
 0x11c   :  { %v578_v10 = vsel %vm577_vm1, %v1533_v26, %v576_v24  ;;  %v583_v58 = vmul.f32 %v1181_v63, %v1560_v17  ;;  %v419_v25 = vmul.f32 %v1521_v21, %v1521_v21  ;;  %vm696_vm6 = vcmp.eq.f32.partialorder %v1577_v54, inf }
 0x11d   :  { %v581_v37 = vsel %vm579_vm2, %v580_v15, %v578_v10  ;;  %v699_v38 = vand.u32 2147483648, %v1577_v54  ;;  %v482_v18 = vadd.f32 %v450_v30, %v418_v13  ;;  %v690_v42 = vsel %vm689_vm3, %v1535_v27, %v688_v31 }
 0x11e   :  { %v1183_v0 = vpop.eup %1182  ;;  %v585_v39 = vsel %vm584_vm4, %v1560_v17, %v583_v58  ;;  %v435_v20 = vmul.f32 %v1529_v16, %v1529_v16  ;;  %v451_v21 = vmul.f32 %v1531_v22, %v1531_v22  ;;  %v404_v56 = vmul.f32 %v1537_v52, %v1537_v52 }
 0x11f   :  { %v588_v26 = vsel %vm586_vm5, %v587_v53, %v585_v39  ;;  %v695_v47 = vmul.f32 %v1183_v0, %v1577_v54  ;;  %v1665_v55 = vadd.f32 1e-09, %v482_v18  ;;  %v436_v17 = vmul.f32 %v1545_v33, %v1545_v33 }
 0x120   :  { %v1042_v43 = vpack.c.bf16 %v588_v26, %v581_v37  ;;  %v467_v61 = vadd.f32 %v435_v20, %v403_v19  ;;  %v483_v1 = vadd.f32 %v451_v21, %v419_v25  ;;  %vm691_vm7 = vcmp.eq.f32.partialorder %v1535_v27, 0.0 }
 0x121   :  { %v697_v16 = vsel %vm696_vm6, %v1577_v54, %v695_v47  ;;  %vm698_vm8 = vcmp.eq.f32.partialorder %v1577_v54, 0.0  ;;  %1190 = vrsqrt.f32 %v1665_v55  ;;  %v693_v22 = vsel %vm691_vm7, %v692_v34, %v690_v42 }
 0x122   :  { %1102 = vst [vmem:[#allocation2 + $0x20] sm:$0xff] %v1042_v43   ;;  %v700_v2 = vsel %vm698_vm8, %v699_v38, %v697_v16  ;;  %v1677_v52 = vadd.f32 1e-09, %v467_v61  ;;  %v1679_v45 = vadd.f32 1e-09, %v483_v1  ;;  %v420_v27 = vmul.f32 %v1543_v32, %v1543_v32 }
 0x123   :  { %v1185_v4 = vpop.eup %1184  ;;  %v1082_v6 = vpack.c.bf16 %v700_v2, %v693_v22  ;;  %v468_v33 = vadd.f32 %v436_v17, %v404_v56  ;;  %v452_v57 = vmul.f32 %v1551_v35, %v1551_v35  ;;  %vm591_vm9 = vcmp.eq.f32.partialorder %v1622_v48, inf }
 0x124   :  { %v1187_v7 = vpop.eup %1186  ;;  %v590_v54 = vmul.f32 %v1185_v4, %v1622_v48  ;;  %1192 = vrsqrt.f32 %v1677_v52  ;;  %vm593_vm10 = vcmp.eq.f32.partialorder %v1622_v48, 0.0  ;;  %v594_v5 = vand.u32 2147483648, %v1622_v48 }
 0x125   :  { %1110 = vst [vmem:[#allocation2 + $0x60] sm:$0xff] %v1082_v6   ;;  %vm703_vm11 = vcmp.eq.f32.partialorder %v1627_v28, inf  ;;  %1194 = vrsqrt.f32 %v1679_v45  ;;  %v1189_v32 = vpop.eup %1188  ;;  %vm705_vm12 = vcmp.eq.f32.partialorder %v1627_v28, 0.0  ;;  %v706_v35 = vand.u32 2147483648, %v1627_v28 }
 0x126   :  { %vm598_vm13 = vcmp.eq.f32.partialorder %v1629_v29, inf  ;;  %v1695_v8 = vadd.f32 1e-09, %v468_v33  ;;  %v592_v9 = vsel %vm591_vm9, %v1622_v48, %v590_v54  ;;  %v702_v51 = vmul.f32 %v1187_v7, %v1627_v28 }
 0x127   :  { %v597_v11 = vmul.f32 %v1189_v32, %v1629_v29  ;;  %v484_v12 = vadd.f32 %v452_v57, %v420_v27  ;;  %vm600_vm14 = vcmp.eq.f32.partialorder %v1629_v29, 0.0  ;;  %v601_v14 = vand.u32 2147483648, %v1629_v29 }
 0x128   :  { %1196 = vrsqrt.f32 %v1695_v8  ;;  %v405_v36 = vmul.f32 %v1572_v49, %v1572_v49  ;;  %vm710_vm15 = vcmp.eq.f32.partialorder %v1665_v55, inf  ;;  %v421_v23 = vmul.f32 %v1574_v50, %v1574_v50 }
 0x129   :  { %v599_v15 = vsel %vm598_vm13, %v1629_v29, %v597_v11  ;;  %v1707_v62 = vadd.f32 1e-09, %v484_v12  ;;  %v595_v24 = vsel %vm593_vm10, %v594_v5, %v592_v9  ;;  %v437_v13 = vmul.f32 %v1583_v59, %v1583_v59 }
 0x12a   :  { %v602_v41 = vsel %vm600_vm14, %v601_v14, %v599_v15  ;;  %v453_v30 = vmul.f32 %v1585_v60, %v1585_v60  ;;  %v704_v29 = vsel %vm703_vm11, %v1627_v28, %v702_v51  ;;  %v406_v50 = vmul.f32 %v1594_v3, %v1594_v3 }
 0x12b   :  { %v1191_v49 = vpop.eup %1190  ;;  %v1047_v10 = vpack.c.bf16 %v602_v41, %v595_v24  ;;  %1198 = vrsqrt.f32 %v1707_v62  ;;  %vm712_vm0 = vcmp.eq.f32.partialorder %v1665_v55, 0.0  ;;  %v469_v31 = vadd.f32 %v437_v13, %v405_v36 }
 0x12c   :  { %v709_v48 = vmul.f32 %v1191_v49, %v1665_v55  ;;  %v485_v59 = vadd.f32 %v453_v30, %v421_v23  ;;  %v713_v60 = vand.u32 2147483648, %v1665_v55  ;;  %v422_v63 = vmul.f32 %v1596_v44, %v1596_v44 }
 0x12d   :  { %1103 = vst [vmem:[#allocation2 + $0x28] sm:$0xff] %v1047_v10   ;;  %v438_v34 = vmul.f32 %v1606_v46, %v1606_v46  ;;  %v454_v53 = vmul.f32 %v1608_v40, %v1608_v40  ;;  %v707_v3 = vsel %vm705_vm12, %v706_v35, %v704_v29  ;;  %v1737_v25 = vadd.f32 1e-09, %v469_v31 }
 0x12e   :  { %v1193_v58 = vpop.eup %1192  ;;  %v711_v19 = vsel %vm710_vm15, %v1665_v55, %v709_v48  ;;  %v1739_v37 = vadd.f32 1e-09, %v485_v59  ;;  %vm605_vm1 = vcmp.eq.f32.partialorder %v1677_v52, inf  ;;  %vm607_vm2 = vcmp.eq.f32.partialorder %v1677_v52, 0.0 }
 0x12f   :  { %v1195_v38 = vpop.eup %1194  ;;  %v714_v44 = vsel %vm712_vm0, %v713_v60, %v711_v19  ;;  %v604_v18 = vmul.f32 %v1193_v58, %v1677_v52  ;;  %v470_v46 = vadd.f32 %v438_v34, %v406_v50  ;;  %v486_v0 = vadd.f32 %v454_v53, %v422_v63 }
 0x130   :  { %v1087_v42 = vpack.c.bf16 %v714_v44, %v707_v3  ;;  %1200 = vrsqrt.f32 %v1737_v25  ;;  %v716_v39 = vmul.f32 %v1195_v38, %v1679_v45  ;;  %v608_v20 = vand.u32 2147483648, %v1677_v52 }
 0x131   :  { %1202 = vrsqrt.f32 %v1739_v37  ;;  %v606_v28 = vsel %vm605_vm1, %v1677_v52, %v604_v18  ;;  %v502_v26 = vadd.f32 1e-09, %v470_v46  ;;  %vm717_vm3 = vcmp.eq.f32.partialorder %v1679_v45, inf }
 0x132   :  { %v1197_v40 = vpop.eup %1196  ;;  %1111 = vst [vmem:[#allocation2 + $0x68] sm:$0xff] %v1087_v42   ;;  %vm612_vm4 = vcmp.eq.f32.partialorder %v1695_v8, inf  ;;  %v615_v47 = vand.u32 2147483648, %v1695_v8  ;;  %v518_v55 = vadd.f32 1e-09, %v486_v0  ;;  %v609_v43 = vsel %vm607_vm2, %v608_v20, %v606_v28 }
 0x133   :  { %v611_v21 = vmul.f32 %v1197_v40, %v1695_v8  ;;  %vm614_vm5 = vcmp.eq.f32.partialorder %v1695_v8, 0.0  ;;  %1204 = vrsqrt.f32 %v502_v26  ;;  %v718_v1 = vsel %vm717_vm3, %v1679_v45, %v716_v39 }
 0x134   :  { %1206 = vrsqrt.f32 %v518_v55  ;;  %v720_v22 = vand.u32 2147483648, %v1679_v45  ;;  %vm724_vm6 = vcmp.eq.f32.partialorder %v1707_v62, inf  ;;  %v727_v52 = vand.u32 2147483648, %v1707_v62 }
 0x135   :  { %v1199_v56 = vpop.eup %1198  ;;  %v613_v61 = vsel %vm612_vm4, %v1695_v8, %v611_v21  ;;  %vm719_vm7 = vcmp.eq.f32.partialorder %v1679_v45, 0.0  ;;  %vm726_vm8 = vcmp.eq.f32.partialorder %v1707_v62, 0.0  ;;  %vm619_vm9 = vcmp.eq.f32.partialorder %v1737_v25, inf }
 0x136   :  { %v616_v17 = vsel %vm614_vm5, %v615_v47, %v613_v61  ;;  %v723_v16 = vmul.f32 %v1199_v56, %v1707_v62  ;;  %v721_v6 = vsel %vm719_vm7, %v720_v22, %v718_v1  ;;  %vm621_vm10 = vcmp.eq.f32.partialorder %v1737_v25, 0.0 }
 0x137   :  { %v1052_v2 = vpack.c.bf16 %v616_v17, %v609_v43  ;;  %v622_v45 = vand.u32 2147483648, %v1737_v25  ;;  %vm731_vm11 = vcmp.eq.f32.partialorder %v1739_v37, inf  ;;  %vm733_vm12 = vcmp.eq.f32.partialorder %v1739_v37, 0.0 }
 0x138   :  { %v725_v4 = vsel %vm724_vm6, %v1707_v62, %v723_v16  ;;  %v734_v9 = vand.u32 2147483648, %v1739_v37  ;;  %vm626_vm13 = vcmp.eq.f32.partialorder %v502_v26, inf  ;;  %v629_v12 = vand.u32 2147483648, %v502_v26 }
 0x139   :  { %1104 = vst [vmem:[#allocation2 + $0x30] sm:$0xff] %v1052_v2   ;;  %v728_v27 = vsel %vm726_vm8, %v727_v52, %v725_v4  ;;  %vm628_vm14 = vcmp.eq.f32.partialorder %v502_v26, 0.0  ;;  %vm738_vm15 = vcmp.eq.f32.partialorder %v518_v55, inf  ;;  %v741_v15 = vand.u32 2147483648, %v518_v55 }
 0x13a   :  { %v1201_v33 = vpop.eup %1200  ;;  %v1092_v57 = vpack.c.bf16 %v728_v27, %v721_v6  ;;  %vm740_vm0 = vcmp.eq.f32.partialorder %v518_v55, 0.0 }
 0x13b   :  { %v1203_v7 = vpop.eup %1202  ;;  %v618_v54 = vmul.f32 %v1201_v33, %v1737_v25 }
 0x13c   :  { %1112 = vst [vmem:[#allocation2 + $0x70] sm:$0xff] %v1092_v57   ;;  %v730_v5 = vmul.f32 %v1203_v7, %v1739_v37 }
 0x13d   :  { %v1205_v32 = vpop.eup %1204  ;;  %v620_v8 = vsel %vm619_vm9, %v1737_v25, %v618_v54 }
 0x13e   :  { %v1207_v35 = vpop.eup %1206  ;;  %v625_v51 = vmul.f32 %v1205_v32, %v502_v26  ;;  %v732_v11 = vsel %vm731_vm11, %v1739_v37, %v730_v5  ;;  %v623_v62 = vsel %vm621_vm10, %v622_v45, %v620_v8 }
 0x13f   :  { %v737_v14 = vmul.f32 %v1207_v35, %v518_v55  ;;  %v735_v41 = vsel %vm733_vm12, %v734_v9, %v732_v11 }
 0x140   :  { %v627_v36 = vsel %vm626_vm13, %v502_v26, %v625_v51 }
 0x141   :  { %v630_v23 = vsel %vm628_vm14, %v629_v12, %v627_v36  ;;  %v739_v24 = vsel %vm738_vm15, %v518_v55, %v737_v14 }
 0x142   :  { %v1057_v13 = vpack.c.bf16 %v630_v23, %v623_v62  ;;  %v742_v30 = vsel %vm740_vm0, %v741_v15, %v739_v24 }
 0x143   :  { %v1097_v49 = vpack.c.bf16 %v742_v30, %v735_v41 }
 0x144   :  { %1105 = vst [vmem:[#allocation2 + $0x38] sm:$0xff] %v1057_v13  }
 0x145   :  { %1113 = vst [vmem:[#allocation2 + $0x78] sm:$0xff] %v1097_v49  }
 0x146   :  { %1219 = shalt.err (!%p1216_p4)
}
 0x147   :  { %s1220_s23 = scalar_lea.hbm %s1791_s2, 2048 }
 0x148   :  { %p1221_p5 = scmp.ne.s32.totalorder %s1791_s2, %s1220_s23  ;;  %p1224_p6 = scmp.lt.u32.totalorder %s1220_s23, %s1791_s2 }
 0x14a   :  { %p1226_p7 = pnand %p1224_p6, %p1221_p5 }
 0x14c   :  { %1229 = shalt.err (!%p1226_p7)
}
 0x14d   :  { %s1234_s28 = smov 64   ;;  %s1235_s29 = smov 4  }
 0x14e   :  { %914 = dma.vmem_to_hbm [thread:$0]  %s909_s20, 2048, %s1791_s2, [#allocation3], %s1234_s28, %s1234_s28, %s1235_s29  }
 0x14f   :  { %1230 = dma.done.wait [#allocation3], 2048  }
 0x150   :  { %1231 = vsyncadd [#allocation3], 4294965248 }
 0x151   :  { %918 = vsyncpa [#allocation3], 1 }

</bundles_post_ra>
